<compile_context>
chip_gen: v7x
topology: tpu7x:2x2x1
jax: 0.10.0
libtpu: 0.0.40
codegen_flags: <defaults>
</compile_context>

<pallas_src>
import jax
import jax.numpy as jnp
from jax.experimental import pallas as pl
from jax.experimental.pallas import tpu as pltpu


def _sigmoid(z):
    # One EUP tanh + two cheap VPU ops instead of exp + reciprocal.
    return 0.5 * jnp.tanh(0.5 * z) + 0.5


def _mlp_kernel(coef_ref, x_ref, o_ref):
    """coef_ref: (16,256) per-lane coefficients; x_ref/o_ref: (rpt,256) interleaved."""
    x = x_ref[...]                       # lanes: [x0(s0), x1(s0), x0(s1), x1(s1), ...]
    c = coef_ref[...]                    # rows 0..8 = [A0,B0,C0, A1,B1,C1, A2,B2,C2]

    # Partner exchange: lane i needs lane i^1 (the other feature of the same
    # sample).  Two XLU rotates + a select; the mask is derived by rolling an
    # iota so it is correct regardless of pltpu.roll's shift direction.
    n = x.shape[1]
    lane = jax.lax.broadcasted_iota(jnp.int32, x.shape, 1)
    take_r1 = pltpu.roll(lane, shift=1, axis=1) == (lane ^ 1)

    def partner(v):
        return jnp.where(take_r1,
                         pltpu.roll(v, shift=1, axis=1),
                         pltpu.roll(v, shift=n - 1, axis=1))

    def affine(v, r):
        # self * A + partner * B + C, with per-lane-parity coefficients.
        return v * c[r:r + 1, :] + partner(v) * c[r + 1:r + 2, :] + c[r + 2:r + 3, :]

    h = jnp.maximum(affine(x, 0), 0.0)   # linear_0 + ReLU   (VPU only)
    s = _sigmoid(affine(h, 3))           # linear_1 + Sigmoid (EUP tanh)
    o_ref[...] = _sigmoid(affine(s, 6))  # linear_2 + 2-class Softmax via sigmoid(+-d)


def _build_coefs(params, lanes=256):
    """Per-lane-parity coefficient table: even lanes hold the 'component 0'
    formula, odd lanes the 'component 1' formula, for out = self*A + partner*B + C."""
    f32 = jnp.float32
    w0, b0 = params["w0"].astype(f32), params["b0"].reshape(-1).astype(f32)
    w1, b1 = params["w1"].astype(f32), params["b1"].reshape(-1).astype(f32)
    w2, b2 = params["w2"].astype(f32), params["b2"].reshape(-1).astype(f32)
    # Softmax over 2 classes: out0 = sigmoid(u0-u1), out1 = sigmoid(u1-u0).
    dw0 = w2[0, 0] - w2[0, 1]
    dw1 = w2[1, 0] - w2[1, 1]
    db = b2[0] - b2[1]

    even = (jnp.arange(lanes) % 2) == 0

    def pat(a, b):
        return jnp.where(even, a, b)

    coefs = jnp.stack([
        pat(w0[0, 0], w0[1, 1]), pat(w0[1, 0], w0[0, 1]), pat(b0[0], b0[1]),
        pat(w1[0, 0], w1[1, 1]), pat(w1[1, 0], w1[0, 1]), pat(b1[0], b1[1]),
        pat(dw0, -dw1),          pat(dw1, -dw0),          pat(db, -db),
    ]).astype(f32)                                    # (9, 256)
    return jnp.pad(coefs, ((0, 16 - coefs.shape[0]), (0, 0)))   # (16, 256)


def nn_2_relu_sig_forward(x, params, *, max_rows_per_tile=1024):
    """x: (B, 2) float32. params: dict w0,b0,w1,b1,w2,b2 (see make_params)."""
    assert max_rows_per_tile % 8 == 0 and max_rows_per_tile >= 8
    B, in_dim = x.shape
    assert in_dim == 2
    lanes = 256                                     # 128 samples * 2 features per row

    # Adaptive tiling: rows of 128 samples, balanced tiles of <= max_rows_per_tile
    # rows (1024 rows * 256 lanes * 4 B = 1 MiB per block; in+out double-buffered
    # = ~4 MiB VMEM).  Large batches -> multi-tile "parallel" grid.
    rows = pl.cdiv(B, 128)
    rows = pl.cdiv(rows, 8) * 8                     # sublane-align
    ntiles = pl.cdiv(rows, max_rows_per_tile)
    rpt = pl.cdiv(pl.cdiv(rows, ntiles), 8) * 8
    rows = ntiles * rpt
    b_pad = rows * 128

    coefs = _build_coefs(params, lanes)

    xf = x.astype(jnp.float32)
    if b_pad != B:
        xf = jnp.pad(xf, ((0, b_pad - B), (0, 0)))
    x_il = xf.reshape(rows, lanes)                  # free reshape, stays interleaved

    out_il = pl.pallas_call(
        _mlp_kernel,
        out_shape=jax.ShapeDtypeStruct((rows, lanes), jnp.float32),
        grid=(ntiles,),
        in_specs=[
            pl.BlockSpec((16, lanes), lambda i: (0, 0)),    # coef table (resident)
            pl.BlockSpec((rpt, lanes), lambda i: (i, 0)),   # interleaved inputs
        ],
        out_specs=pl.BlockSpec((rpt, lanes), lambda i: (i, 0)),
        compiler_params=pltpu.CompilerParams(
            dimension_semantics=("parallel",)),
    )(coefs, x_il)

    return out_il.reshape(b_pad, 2)[:B]


def make_params(key):
    """Deterministic uniform(-1/sqrt(in), 1/sqrt(in)) init, like the homework."""
    dims = [(2, 2), (2, 2), (2, 2)]
    params = {}
    keys = jax.random.split(key, 2 * len(dims))
    for i, (din, dout) in enumerate(dims):
        bound = 1.0 / jnp.sqrt(jnp.float32(din))
        params[f"w{i}"] = jax.random.uniform(
            keys[2 * i], (din, dout), jnp.float32, -bound, bound)
        params[f"b{i}"] = jax.random.uniform(
            keys[2 * i + 1], (1, dout), jnp.float32, -bound, bound)
    return params


def reference_forward(x, params):
    h = jnp.maximum(x @ params["w0"] + params["b0"], 0.0)
    h = jax.nn.sigmoid(h @ params["w1"] + params["b1"])
    h = h @ params["w2"] + params["b2"]
    return jax.nn.softmax(h, axis=-1)


if __name__ == "__main__":
    key = jax.random.PRNGKey(0)
    k_x, k_p = jax.random.split(key)
    params = make_params(k_p)

    # Case 1: small batch, not a multiple of 128 -> exercises the padding path.
    x1 = jax.random.normal(k_x, (300, 2), jnp.float32)
    out1 = jax.block_until_ready(nn_2_relu_sig_forward(x1, params))
    ref1 = reference_forward(x1, params)
    assert out1.shape == (300, 2)
    assert jnp.allclose(out1, ref1, atol=1e-5, rtol=1e-5)
    assert jnp.allclose(jnp.sum(out1, axis=-1), 1.0, atol=1e-5)

    # Case 2: force a multi-tile grid (small tile) to exercise the pipeline path.
    x2 = jax.random.normal(k_x, (5000, 2), jnp.float32)
    out2 = jax.block_until_ready(
        nn_2_relu_sig_forward(x2, params, max_rows_per_tile=8))
    ref2 = reference_forward(x2, params)
    assert out2.shape == (5000, 2)
    assert jnp.allclose(out2, ref2, atol=1e-5, rtol=1e-5)
    assert jnp.allclose(jnp.sum(out2, axis=-1), 1.0, atol=1e-5)

    print("KERNEL_OK")
</pallas_src>

<mosaic_0001>
module attributes {stable_mosaic.version = 11 : i64} {
  func.func @_mlp_kernel(%arg0: i32, %arg1: memref<16x256xf32, #tpu.memory_space<vmem>>, %arg2: memref<8x256xf32, #tpu.memory_space<vmem>>, %arg3: memref<8x256xf32, #tpu.memory_space<vmem>>) attributes {dimension_semantics = [#tpu.dimension_semantics<parallel>], iteration_bounds = array<i64: 1>, scalar_prefetch = 0 : i64, scratch_operands = 0 : i64, tpu.core_type = #tpu.core_type<tc>, window_params = [{pipeline_mode = #tpu.pipeline_mode<synchronous>, transform_indices = @transform_0, window_bounds = array<i64: 16, 256>}, {transform_indices = @transform_1, window_bounds = array<i64: 8, 256>}, {transform_indices = @transform_2, window_bounds = array<i64: 8, 256>}]} {
    %c0 = arith.constant 0 : index
    %c0_0 = arith.constant 0 : index
    %0 = vector.load %arg2[%c0, %c0_0] : memref<8x256xf32, #tpu.memory_space<vmem>>, vector<8x256xf32>
    %c0_1 = arith.constant 0 : index
    %c0_2 = arith.constant 0 : index
    %1 = vector.load %arg1[%c0_1, %c0_2] : memref<16x256xf32, #tpu.memory_space<vmem>>, vector<16x256xf32>
    %2 = tpu.iota {dimensions = array<i32: 1>} : vector<8x256xi32>
    %c1_i32 = arith.constant 1 : i32
    %3 = tpu.dynamic_rotate %2 by %c1_i32 dim 1 : vector<8x256xi32>, i32 -> vector<8x256xi32>
    %c1_i32_3 = arith.constant 1 : i32
    %4 = vector.broadcast %c1_i32_3 : i32 to vector<8x256xi32>
    %5 = arith.xori %2, %4 : vector<8x256xi32>
    %6 = arith.cmpi eq, %3, %5 : vector<8x256xi32>
    %7 = vector.extract_strided_slice %1 {offsets = [0, 0], sizes = [1, 256], strides = [1, 1]} : vector<16x256xf32> to vector<1x256xf32>
    %8 = vector.broadcast %7 : vector<1x256xf32> to vector<8x256xf32>
    %9 = arith.mulf %0, %8 : vector<8x256xf32>
    %c1_i32_4 = arith.constant 1 : i32
    %10 = tpu.dynamic_rotate %0 by %c1_i32_4 dim 1 : vector<8x256xf32>, i32 -> vector<8x256xf32>
    %c255_i32 = arith.constant 255 : i32
    %11 = tpu.dynamic_rotate %0 by %c255_i32 dim 1 : vector<8x256xf32>, i32 -> vector<8x256xf32>
    %12 = arith.select %6, %10, %11 : vector<8x256xi1>, vector<8x256xf32>
    %13 = vector.extract_strided_slice %1 {offsets = [1, 0], sizes = [1, 256], strides = [1, 1]} : vector<16x256xf32> to vector<1x256xf32>
    %14 = vector.broadcast %13 : vector<1x256xf32> to vector<8x256xf32>
    %15 = arith.mulf %12, %14 : vector<8x256xf32>
    %16 = arith.addf %9, %15 : vector<8x256xf32>
    %17 = vector.extract_strided_slice %1 {offsets = [2, 0], sizes = [1, 256], strides = [1, 1]} : vector<16x256xf32> to vector<1x256xf32>
    %18 = vector.broadcast %17 : vector<1x256xf32> to vector<8x256xf32>
    %19 = arith.addf %16, %18 : vector<8x256xf32>
    %cst = arith.constant 0.000000e+00 : f32
    %20 = vector.broadcast %cst : f32 to vector<8x256xf32>
    %21 = arith.maximumf %19, %20 : vector<8x256xf32>
    %22 = vector.extract_strided_slice %1 {offsets = [3, 0], sizes = [1, 256], strides = [1, 1]} : vector<16x256xf32> to vector<1x256xf32>
    %23 = vector.broadcast %22 : vector<1x256xf32> to vector<8x256xf32>
    %24 = arith.mulf %21, %23 : vector<8x256xf32>
    %c1_i32_5 = arith.constant 1 : i32
    %25 = tpu.dynamic_rotate %21 by %c1_i32_5 dim 1 : vector<8x256xf32>, i32 -> vector<8x256xf32>
    %c255_i32_6 = arith.constant 255 : i32
    %26 = tpu.dynamic_rotate %21 by %c255_i32_6 dim 1 : vector<8x256xf32>, i32 -> vector<8x256xf32>
    %27 = arith.select %6, %25, %26 : vector<8x256xi1>, vector<8x256xf32>
    %28 = vector.extract_strided_slice %1 {offsets = [4, 0], sizes = [1, 256], strides = [1, 1]} : vector<16x256xf32> to vector<1x256xf32>
    %29 = vector.broadcast %28 : vector<1x256xf32> to vector<8x256xf32>
    %30 = arith.mulf %27, %29 : vector<8x256xf32>
    %31 = arith.addf %24, %30 : vector<8x256xf32>
    %32 = vector.extract_strided_slice %1 {offsets = [5, 0], sizes = [1, 256], strides = [1, 1]} : vector<16x256xf32> to vector<1x256xf32>
    %33 = vector.broadcast %32 : vector<1x256xf32> to vector<8x256xf32>
    %34 = arith.addf %31, %33 : vector<8x256xf32>
    %cst_7 = arith.constant 5.000000e-01 : f32
    %35 = vector.broadcast %cst_7 : f32 to vector<8x256xf32>
    %36 = arith.mulf %35, %34 : vector<8x256xf32>
    %37 = math.tanh %36 : vector<8x256xf32>
    %cst_8 = arith.constant 5.000000e-01 : f32
    %38 = vector.broadcast %cst_8 : f32 to vector<8x256xf32>
    %39 = arith.mulf %38, %37 : vector<8x256xf32>
    %cst_9 = arith.constant 5.000000e-01 : f32
    %40 = vector.broadcast %cst_9 : f32 to vector<8x256xf32>
    %41 = arith.addf %39, %40 : vector<8x256xf32>
    %42 = vector.extract_strided_slice %1 {offsets = [6, 0], sizes = [1, 256], strides = [1, 1]} : vector<16x256xf32> to vector<1x256xf32>
    %43 = vector.broadcast %42 : vector<1x256xf32> to vector<8x256xf32>
    %44 = arith.mulf %41, %43 : vector<8x256xf32>
    %c1_i32_10 = arith.constant 1 : i32
    %45 = tpu.dynamic_rotate %41 by %c1_i32_10 dim 1 : vector<8x256xf32>, i32 -> vector<8x256xf32>
    %c255_i32_11 = arith.constant 255 : i32
    %46 = tpu.dynamic_rotate %41 by %c255_i32_11 dim 1 : vector<8x256xf32>, i32 -> vector<8x256xf32>
    %47 = arith.select %6, %45, %46 : vector<8x256xi1>, vector<8x256xf32>
    %48 = vector.extract_strided_slice %1 {offsets = [7, 0], sizes = [1, 256], strides = [1, 1]} : vector<16x256xf32> to vector<1x256xf32>
    %49 = vector.broadcast %48 : vector<1x256xf32> to vector<8x256xf32>
    %50 = arith.mulf %47, %49 : vector<8x256xf32>
    %51 = arith.addf %44, %50 : vector<8x256xf32>
    %52 = vector.extract_strided_slice %1 {offsets = [8, 0], sizes = [1, 256], strides = [1, 1]} : vector<16x256xf32> to vector<1x256xf32>
    %53 = vector.broadcast %52 : vector<1x256xf32> to vector<8x256xf32>
    %54 = arith.addf %51, %53 : vector<8x256xf32>
    %cst_12 = arith.constant 5.000000e-01 : f32
    %55 = vector.broadcast %cst_12 : f32 to vector<8x256xf32>
    %56 = arith.mulf %55, %54 : vector<8x256xf32>
    %57 = math.tanh %56 : vector<8x256xf32>
    %cst_13 = arith.constant 5.000000e-01 : f32
    %58 = vector.broadcast %cst_13 : f32 to vector<8x256xf32>
    %59 = arith.mulf %58, %57 : vector<8x256xf32>
    %cst_14 = arith.constant 5.000000e-01 : f32
    %60 = vector.broadcast %cst_14 : f32 to vector<8x256xf32>
    %61 = arith.addf %59, %60 : vector<8x256xf32>
    %c0_15 = arith.constant 0 : index
    %c0_16 = arith.constant 0 : index
    %62 = vector.load %arg3[%c0_15, %c0_16] : memref<8x256xf32, #tpu.memory_space<vmem>>, vector<8x256xf32>
    tpu.vector_store %arg3[%c0_15, %c0_16], %61 {strides = array<i32>} : memref<8x256xf32, #tpu.memory_space<vmem>>, vector<8x256xf32>,
    return
  }
  func.func @transform_0(%arg0: i32) -> (i32, i32) {
    %c0_i32 = arith.constant 0 : i32
    %c0_i32_0 = arith.constant 0 : i32
    %c0_i32_1 = arith.constant 0 : i32
    return %c0_i32, %c0_i32_0 : i32, i32
  }
  func.func @transform_1(%arg0: i32) -> (i32, i32) {
    %c0_i32 = arith.constant 0 : i32
    %c0_i32_0 = arith.constant 0 : i32
    return %arg0, %c0_i32 : i32, i32
  }
  func.func @transform_2(%arg0: i32) -> (i32, i32) {
    %c0_i32 = arith.constant 0 : i32
    %c0_i32_0 = arith.constant 0 : i32
    return %arg0, %c0_i32 : i32, i32
  }
}

</mosaic_0001>

<bundles_post_ra>
// kernel: tpu_custom_call.1
= control target key start
LH: loop header
LB: loop body
LE: loop exit
PB: predicated region body
PF: predicated region fallthrough
CT: control target
= control target key end

     0   :  { %7 = vsyncpa [#allocation3], 0  ;;  %s483_s0 = inlined_call_operand.hbm [shape: f32[16,256], index: 0, kind: input, shape index: {}]   ;;  %s484_s1 = inlined_call_operand.hbm [shape: f32[8,256], index: 1, kind: input, shape index: {}]   ;;  %s485_s2 = inlined_call_operand.hbm [shape: f32[8,256], index: 2, kind: output, shape index: {}]  }
   0x1   :  { %8 = vsyncpa [#allocation6], 0 }
   0x2   :  { %9 = vsyncpa [#allocation4], 0  ;;  %s320_s9 = smov [#allocation2]   ;;  %s248_s13 = scalar_lea.hbm %s483_s0, 512 }
   0x3   :  { %s15_s10 = sshll.u32 %s320_s9, 4  ;;  %p249_p0 = scmp.ne.s32.totalorder %s483_s0, %s248_s13  ;;  %s16_s10 = int_to_ptr.vmem [resolvable:$true] %s15_s10 }
   0x4   :  { %p252_p1 = scmp.lt.u32.totalorder %s248_s13, %s483_s0 }
   0x6   :  { %p254_p2 = pnand %p252_p1, %p249_p0 }
   0x8   :  { %257 = shalt.err (!%p254_p2)
}
   0x9   :  { %s258_s18 = scalar_lea.vmem %s16_s10, 512  ;;  %p263_p4 = scmp.lt.s32.totalorder %s16_s10, %s16_s10 }
   0xa   :  { %p259_p3 = scmp.ne.s32.totalorder %s16_s10, %s258_s18  ;;  %p264_p5 = scmp.lt.s32.totalorder %s258_s18, %s258_s18 }
   0xc   :  { %p265_p6 = por %p264_p5, %p263_p4 }
   0xe   :  { %p266_p7 = pnand %p265_p6, %p259_p3 }
  0x10   :  { %269 = shalt.err (!%p266_p7)
}
  0x11   :  { %s321_s19 = smov 256   ;;  %s322_s20 = smov 16  }
  0x12   :  { %21 = dma.hbm_to_vmem [thread:$0]  %s483_s0, 512, %s16_s10, [#allocation3], %s321_s19, %s321_s19, %s322_s20  }
  0x13   :  { %s323_s23 = smov [#allocation5]   ;;  %s270_s27 = scalar_lea.hbm %s484_s1, 256 }
  0x14   :  { %s28_s24 = sshll.u32 %s323_s23, 4  ;;  %p271_p8 = scmp.ne.s32.totalorder %s484_s1, %s270_s27  ;;  %s29_s24 = int_to_ptr.vmem [resolvable:$true] %s28_s24 }
  0x15   :  { %p274_p9 = scmp.lt.u32.totalorder %s270_s27, %s484_s1 }
  0x17   :  { %p276_p10 = pnand %p274_p9, %p271_p8 }
  0x19   :  { %279 = shalt.err (!%p276_p10)
}
  0x1a   :  { %s280_s4 = scalar_lea.vmem %s29_s24, 256  ;;  %p285_p12 = scmp.lt.s32.totalorder %s29_s24, %s29_s24 }
  0x1b   :  { %p281_p11 = scmp.ne.s32.totalorder %s29_s24, %s280_s4  ;;  %p286_p13 = scmp.lt.s32.totalorder %s280_s4, %s280_s4 }
  0x1d   :  { %p287_p0 = por %p286_p13, %p285_p12 }
  0x1f   :  { %p288_p1 = pnand %p287_p0, %p281_p11 }
  0x21   :  { %291 = shalt.err (!%p288_p1)
}
  0x22   :  { %31 = dma.hbm_to_vmem [thread:$0]  %s484_s1, 256, %s29_s24, [#allocation6]  }
  0x23   :  { %314 = dma.done.wait [#allocation3], 512  }
  0x24   :  { %315 = vsyncadd [#allocation3], 4294966784 }
  0x25   :  { %316 = dma.done.wait [#allocation6], 256  }
  0x26   :  { %317 = vsyncadd [#allocation6], 4294967040  ;;  %v44_v0 = vlaneseq  ;;  %s324_s6 = smov 1   ;;  %v38_v3 = vld [vmem:[#allocation5] sm:$0xff]  ;;  %v39_v4 = vld [vmem:[#allocation5 + $0x8] sm:$0xff]  ;;  %s325_s1 = smov 127  }
  0x27   :  { %68 = vrot.lane.b32.xlu1 %v38_v3, %s324_s6  ;;  %v381_v9 = vld [vmem:[#allocation2] sm:$0xff]  ;;  %v383_v10 = vld [vmem:[#allocation2 + $0x8] sm:$0xff]  ;;  %s326_s7 = smov [#allocation7]  }
  0x28   :  { %v366_v1 = vand.u32 127, %v44_v0  ;;  %v376_v5 = vshrl.u32 %v44_v0, 7  ;;  %s223_s8 = sshll.u32 %s326_s7, 4  ;;  %s224_s8 = int_to_ptr.vmem [resolvable:$true] %s223_s8 }
  0x29   :  { %s292_s9 = scalar_lea.vmem %s224_s8, 256  ;;  %p297_p3 = scmp.lt.s32.totalorder %s224_s8, %s224_s8 }
  0x2a   :  { %47 = vrot.lane.b32.xlu0 %v366_v1, %s324_s6  ;;  %v46_v2 = vadd.s32 128, %v366_v1  ;;  %v379_v7 = vsub.s32 0, %v376_v5  ;;  %vm51_vm0 = vcmp.lt.s32.totalorder %v366_v1, 1  ;;  %v85_v12 = vsub.s32 1, %v376_v5  ;;  %p293_p2 = scmp.ne.s32.totalorder %s224_s8, %s292_s9  ;;  %p298_p4 = scmp.lt.s32.totalorder %s292_s9, %s292_s9 }
  0x2b   :  { %70 = vrot.lane.b32.xlu1 %v39_v4, %s324_s6  ;;  %v54_v15 = vxor.u32 1, %v366_v1  ;;  %vm78_vm1 = vcmp.lt.s32.totalorder %v366_v1, 127  ;;  %v97_v23 = vsub.s32 2, %v376_v5  ;;  %v109_v45 = vsub.s32 3, %v376_v5 }
  0x2c   :  { %v61_v13 = vrot.slane %v381_v9, %v379_v7  ;;  %v65_v14 = vrot.slane %v383_v10, %v379_v7  ;;  %v55_v16 = vxor.u32 1, %v46_v2  ;;  %v86_v21 = vrot.slane %v381_v9, %v85_v12  ;;  %p299_p5 = por %p298_p4, %p297_p3 }
  0x2d   :  { %v90_v22 = vrot.slane %v383_v10, %v85_v12  ;;  %v102_v37 = vrot.slane %v383_v10, %v97_v23  ;;  %v98_v38 = vrot.slane %v381_v9, %v97_v23  ;;  %v133_v46 = vsub.s32 4, %v376_v5 }
  0x2e   :  { %49 = vrot.lane.b32.xlu0 %v46_v2, %s324_s6  ;;  %v66_v24 = vmul.f32 %v61_v13, %v38_v3  ;;  %v67_v25 = vmul.f32 %v65_v14, %v39_v4  ;;  %v145_v49 = vsub.s32 5, %v376_v5  ;;  %v114_v50 = vrot.slane %v383_v10, %v109_v45  ;;  %p300_p6 = pnand %p299_p5, %p293_p2 }
  0x2f   :  { %76 = vrot.lane.b32.xlu1 %v39_v4, %s325_s1  ;;  %v110_v51 = vrot.slane %v381_v9, %v109_v45  ;;  %v134_v52 = vrot.slane %v381_v9, %v133_v46  ;;  %v138_v53 = vrot.slane %v383_v10, %v133_v46  ;;  %v187_v23 = vsub.s32 7, %v376_v5 }
  0x30   :  { %v150_v62 = vrot.slane %v383_v10, %v145_v49  ;;  %v146_v63 = vrot.slane %v381_v9, %v145_v49 }
  0x32   :  { %74 = vrot.lane.b32.xlu0 %v38_v3, %s325_s1 }
  0x99   :  { %v69_v8 = vpop.permute.xlu1 %68 }
  0x9c   :  { %v48_v6 = vpop.permute.xlu0 %47 }
  0x9d   :  { %v71_v17 = vpop.permute.xlu1 %70 }
  0x9e   :  { %v72_v29 = vsel %vm51_vm0, %v69_v8, %v71_v17  ;;  %v73_v30 = vsel %vm51_vm0, %v71_v17, %v69_v8 }
  0xa0   :  { %v50_v11 = vpop.permute.xlu0 %49 }
  0xa1   :  { %v52_v18 = vsel %vm51_vm0, %v48_v6, %v50_v11  ;;  %v53_v19 = vsel %vm51_vm0, %v50_v11, %v48_v6  ;;  %v77_v28 = vpop.permute.xlu1 %76 }
  0xa2   :  { %vm400_vm2 = vcmp.eq.s32.totalorder %v53_v19, %v54_v15  ;;  %vm404_vm3 = vcmp.eq.s32.totalorder %v52_v18, %v55_v16 }
  0xa4   :  { %v75_v20 = vpop.permute.xlu0 %74 }
  0xa5   :  { %v79_v31 = vsel %vm78_vm1, %v75_v20, %v77_v28  ;;  %v80_v32 = vsel %vm78_vm1, %v77_v28, %v75_v20 }
  0xa6   :  { %v81_v33 = vsel %vm400_vm2, %v73_v30, %v79_v31  ;;  %v82_v34 = vsel %vm404_vm3, %v72_v29, %v80_v32  ;;  %v42_v30 = vld [vmem:[#allocation2 + $0x10] sm:$0xff]  ;;  %v43_v31 = vld [vmem:[#allocation2 + $0x18] sm:$0xff]  ;;  %v188_v32 = vrot.slane %v381_v9, %v187_v23 }
  0xa7   :  { %v91_v35 = vmul.f32 %v86_v21, %v81_v33  ;;  %v92_v36 = vmul.f32 %v90_v22, %v82_v34  ;;  %v163_v21 = vsub.s32 6, %v376_v5  ;;  %v192_v33 = vrot.slane %v383_v10, %v187_v23 }
  0xa9   :  { %v94_v39 = vadd.f32 %v92_v36, %v67_v25  ;;  %v93_v40 = vadd.f32 %v91_v35, %v66_v24  ;;  %v168_v25 = vrot.slane %v383_v10, %v163_v21  ;;  %v164_v28 = vrot.slane %v381_v9, %v163_v21 }
  0xab   :  { %v104_v41 = vadd.f32 %v102_v37, %v94_v39  ;;  %v103_v42 = vadd.f32 %v98_v38, %v93_v40  ;;  %v200_v38 = vrot.slane %v42_v30, %v379_v7  ;;  %v204_v39 = vrot.slane %v43_v31, %v379_v7 }
  0xad   :  { %v106_v43 = vmax.f32 %v104_v41, 0.0  ;;  %v105_v44 = vmax.f32 %v103_v42, 0.0 }
  0xaf   :  { %119 = vrot.lane.b32.xlu1 %v106_v43, %s324_s6  ;;  %117 = vrot.lane.b32.xlu0 %v105_v44, %s324_s6  ;;  %v116_v0 = vmul.f32 %v114_v50, %v106_v43  ;;  %v115_v2 = vmul.f32 %v110_v51, %v105_v44 }
  0xb3   :  { %125 = vrot.lane.b32.xlu1 %v106_v43, %s325_s1  ;;  %123 = vrot.lane.b32.xlu0 %v105_v44, %s325_s1 }
 0x121   :  { %v120_v47 = vpop.permute.xlu1 %119  ;;  %v118_v48 = vpop.permute.xlu0 %117 }
 0x122   :  { %v121_v56 = vsel %vm51_vm0, %v118_v48, %v120_v47  ;;  %v122_v57 = vsel %vm51_vm0, %v120_v47, %v118_v48 }
 0x125   :  { %v126_v54 = vpop.permute.xlu1 %125  ;;  %v124_v55 = vpop.permute.xlu0 %123 }
 0x126   :  { %v127_v58 = vsel %vm78_vm1, %v124_v55, %v126_v54  ;;  %v128_v59 = vsel %vm78_vm1, %v126_v54, %v124_v55 }
 0x127   :  { %v129_v60 = vsel %vm400_vm2, %v122_v57, %v127_v58  ;;  %v130_v61 = vsel %vm404_vm3, %v121_v56, %v128_v59 }
 0x128   :  { %v139_v3 = vmul.f32 %v134_v52, %v129_v60  ;;  %v140_v4 = vmul.f32 %v138_v53, %v130_v61 }
 0x12a   :  { %v141_v6 = vadd.f32 %v139_v3, %v115_v2  ;;  %v142_v8 = vadd.f32 %v140_v4, %v116_v0 }
 0x12c   :  { %v152_v11 = vadd.f32 %v150_v62, %v142_v8  ;;  %v151_v12 = vadd.f32 %v146_v63, %v141_v6 }
 0x12e   :  { %v154_v13 = vmul.f32 0.5, %v152_v11  ;;  %v153_v14 = vmul.f32 0.5, %v151_v12 }
 0x130   :  { %240 = vtanh.f32 %v154_v13 }
 0x131   :  { %242 = vtanh.f32 %v153_v14 }
 0x13a   :  { %v241_v15 = vpop.eup %240 }
 0x13b   :  { %v243_v16 = vpop.eup %242  ;;  %v158_v17 = vmul.f32 0.5, %v241_v15 }
 0x13c   :  { %v157_v18 = vmul.f32 0.5, %v243_v16 }
 0x13d   :  { %v160_v19 = vadd.f32 0.5, %v158_v17 }
 0x13e   :  { %v159_v20 = vadd.f32 0.5, %v157_v18 }
 0x13f   :  { %173 = vrot.lane.b32.xlu1 %v160_v19, %s324_s6  ;;  %v170_v40 = vmul.f32 %v168_v25, %v160_v19 }
 0x140   :  { %171 = vrot.lane.b32.xlu0 %v159_v20, %s324_s6  ;;  %v169_v41 = vmul.f32 %v164_v28, %v159_v20 }
 0x143   :  { %179 = vrot.lane.b32.xlu1 %v160_v19, %s325_s1 }
 0x144   :  { %177 = vrot.lane.b32.xlu0 %v159_v20, %s325_s1 }
 0x1b1   :  { %v174_v22 = vpop.permute.xlu1 %173 }
 0x1b2   :  { %v172_v24 = vpop.permute.xlu0 %171 }
 0x1b3   :  { %v175_v35 = vsel %vm51_vm0, %v172_v24, %v174_v22  ;;  %v176_v36 = vsel %vm51_vm0, %v174_v22, %v172_v24 }
 0x1b5   :  { %v180_v29 = vpop.permute.xlu1 %179 }
 0x1b6   :  { %v178_v34 = vpop.permute.xlu0 %177 }
 0x1b7   :  { %v181_v5 = vsel %vm78_vm1, %v178_v34, %v180_v29  ;;  %v182_v37 = vsel %vm78_vm1, %v180_v29, %v178_v34 }
 0x1b8   :  { %v183_v9 = vsel %vm400_vm2, %v176_v36, %v181_v5  ;;  %v184_v10 = vsel %vm404_vm3, %v175_v35, %v182_v37 }
 0x1b9   :  { %v193_v42 = vmul.f32 %v188_v32, %v183_v9  ;;  %v194_v43 = vmul.f32 %v192_v33, %v184_v10 }
 0x1bb   :  { %v195_v44 = vadd.f32 %v193_v42, %v169_v41  ;;  %v196_v45 = vadd.f32 %v194_v43, %v170_v40 }
 0x1bd   :  { %v205_v46 = vadd.f32 %v200_v38, %v195_v44  ;;  %v206_v47 = vadd.f32 %v204_v39, %v196_v45 }
 0x1bf   :  { %v207_v1 = vmul.f32 0.5, %v205_v46  ;;  %v208_v48 = vmul.f32 0.5, %v206_v47 }
 0x1c1   :  { %244 = vtanh.f32 %v207_v1 }
 0x1c2   :  { %246 = vtanh.f32 %v208_v48 }
 0x1cb   :  { %v245_v49 = vpop.eup %244 }
 0x1cc   :  { %v247_v7 = vpop.eup %246  ;;  %v211_v50 = vmul.f32 0.5, %v245_v49 }
 0x1cd   :  { %v212_v26 = vmul.f32 0.5, %v247_v7 }
 0x1ce   :  { %v213_v27 = vadd.f32 0.5, %v211_v50 }
 0x1cf   :  { %v214_v51 = vadd.f32 0.5, %v212_v26 }
 0x1d0   :  { %215 = vst [vmem:[#allocation7] sm:$0xff] %v213_v27 }
 0x1d1   :  { %216 = vst [vmem:[#allocation7 + $0x8] sm:$0xff] %v214_v51 }
 0x1d2   :  { %303 = shalt.err (!%p300_p6)
}
 0x1d3   :  { %s304_s12 = scalar_lea.hbm %s485_s2, 256 }
 0x1d4   :  { %p305_p7 = scmp.ne.s32.totalorder %s485_s2, %s304_s12  ;;  %p308_p8 = scmp.lt.u32.totalorder %s304_s12, %s485_s2 }
 0x1d6   :  { %p310_p9 = pnand %p308_p8, %p305_p7 }
 0x1d8   :  { %313 = shalt.err (!%p310_p9)
}
 0x1d9   :  { %226 = dma.vmem_to_hbm [thread:$0]  %s224_s8, 256, %s485_s2, [#allocation4]  }
 0x1da   :  { %318 = dma.done.wait [#allocation4], 256  }
 0x1db   :  { %319 = vsyncadd [#allocation4], 4294967040 }
 0x1dc   :  { %230 = vsyncpa [#allocation3], 1 }
 0x1dd   :  { %231 = vsyncpa [#allocation6], 1 }
 0x1de   :  { %232 = vsyncpa [#allocation4], 1 }

</bundles_post_ra>
